<compile_context>
chip_gen: v5e
topology: v5e:2x2
jax: 0.10.0
libtpu: 0.0.40
codegen_flags: <defaults>
</compile_context>

<pallas_src>
import functools

import jax
import jax.numpy as jnp
from jax import lax
from jax.experimental import pallas as pl
from jax.experimental.pallas import tpu as pltpu


def _label_smoothing_kernel(output_ref, target_ref, loss_ref, *, eps, num_classes,
                            ignore_index):
    """Per-row smoothed NLL for one (TILE_B, C) tile.

    output_ref: (TILE_B, C) logits (native dtype) in VMEM
    target_ref: (TILE_B, 1) int32 class indices in VMEM
    loss_ref:   (TILE_B, 1) float32 per-example loss in VMEM
    """
    logits = output_ref[...].astype(jnp.float32)            # (TB, C)
    tgt = target_ref[...]                                    # (TB, 1) int32

    non_pad = (tgt != ignore_index)                          # (TB, 1) bool
    tgt_clean = jnp.where(non_pad, tgt, 0)                   # ignore_index -> class 0

    tb, c = logits.shape
    class_ids = lax.broadcasted_iota(jnp.int32, (tb, c), 1)  # (TB, C)
    tgt_mask = (class_ids == tgt_clean)                      # (TB, C) bool

    # log_softmax pieces (lane-axis reductions go to the XLU, exp to the EUP).
    row_max = jnp.max(logits, axis=-1, keepdims=True)        # (TB, 1)
    shifted = logits - row_max                                # (TB, C)
    sum_exp = jnp.sum(jnp.exp(shifted), axis=-1, keepdims=True)
    lse = jnp.log(sum_exp)                                    # (TB, 1)

    # sum_j log_prb_j = sum_j shifted_j - C * lse
    sum_shifted = jnp.sum(shifted, axis=-1, keepdims=True)    # (TB, 1)
    sum_log_prb = sum_shifted - float(c) * lse                # (TB, 1)

    # log_prb at the target class = shifted[tgt] - lse (masked select + lane sum)
    shifted_at_tgt = jnp.sum(jnp.where(tgt_mask, shifted, 0.0),
                             axis=-1, keepdims=True)          # (TB, 1)
    log_prb_tgt = shifted_at_tgt - lse                        # (TB, 1)

    # q_j = eps/C for j != tgt, q_tgt = 1 - eps  (matches the given PyTorch module,
    # which smooths with eps / num_classes).
    smooth = eps / num_classes                                # compile-time scalar
    loss = -(smooth * sum_log_prb + (1.0 - eps - smooth) * log_prb_tgt)

    loss_ref[...] = jnp.where(non_pad, loss, 0.0)


def label_smoothing_loss(output, target, *, label_smoothing, tgt_vocab_size,
                         ignore_index=-100, block_rows=None):
    """JAX/Pallas equivalent of LabelSmoothingLoss.forward.

    output: (B, C) float  -- model scores (pre-softmax), any float dtype
    target: (B,) int      -- class indices, possibly == ignore_index
    returns: (B,) float32 per-example loss
    """
    assert 0.0 < label_smoothing <= 1.0
    b, c = output.shape
    assert c == tgt_vocab_size

    # --- choose the batch tile -------------------------------------------------
    # Keep the double-buffered logits tile (2 * block_rows * C * itemsize) within
    # a conservative ~12 MiB so it fits the default scoped VMEM on every
    # generation (v5e/v6e defaults 16/32 MiB; v7x has 64 MiB physical).
    if block_rows is None:
        itemsize = jnp.dtype(output.dtype).itemsize
        budget_per_buffer = 6 * 1024 * 1024
        block_rows = max(8, min(1024, (budget_per_buffer // (c * itemsize)) // 8 * 8))
    # Never tile wider than the (8-rounded) batch.
    b_rounded8 = ((b + 7) // 8) * 8
    block_rows = max(8, min(block_rows, b_rounded8))

    num_tiles = pl.cdiv(b, block_rows)
    b_pad = num_tiles * block_rows

    if b_pad != b:
        output = jnp.pad(output, ((0, b_pad - b), (0, 0)))
        target = jnp.pad(target, (0, b_pad - b), constant_values=ignore_index)

    target_2d = target.astype(jnp.int32).reshape(b_pad, 1)

    kernel = functools.partial(
        _label_smoothing_kernel,
        eps=float(label_smoothing),
        num_classes=int(tgt_vocab_size),
        ignore_index=int(ignore_index),
    )

    loss_2d = pl.pallas_call(
        kernel,
        out_shape=jax.ShapeDtypeStruct((b_pad, 1), jnp.float32),
        grid=(num_tiles,),
        in_specs=[
            pl.BlockSpec((block_rows, c), lambda i: (i, 0)),
            pl.BlockSpec((block_rows, 1), lambda i: (i, 0)),
        ],
        out_specs=pl.BlockSpec((block_rows, 1), lambda i: (i, 0)),
        compiler_params=pltpu.CompilerParams(
            dimension_semantics=("parallel",)),
    )(output, target_2d)

    return loss_2d.reshape(b_pad)[:b]


def _reference(output, target, *, label_smoothing, tgt_vocab_size, ignore_index=-100):
    """Pure-JAX reference mirroring the PyTorch module."""
    non_pad = (target != ignore_index).astype(jnp.float32)
    tgt = jnp.where(target == ignore_index, 0, target)
    one_hot = jax.nn.one_hot(tgt, tgt_vocab_size, dtype=jnp.float32)
    q = one_hot * (1 - label_smoothing) + (1 - one_hot) * label_smoothing / tgt_vocab_size
    log_prb = jax.nn.log_softmax(output.astype(jnp.float32), axis=-1)
    loss = -(q * log_prb).sum(axis=-1)
    return loss * non_pad


if __name__ == "__main__":
    key = jax.random.PRNGKey(0)
    k1, k2, k3, k4 = jax.random.split(key, 4)

    eps = 0.1
    ignore_index = -100

    # Case 1: small aligned shapes.
    b1, v1 = 8, 32
    out1 = jax.random.normal(k1, (b1, v1), dtype=jnp.float32)
    tgt1 = jax.random.randint(k2, (b1,), 0, v1, dtype=jnp.int32)
    tgt1 = tgt1.at[1].set(ignore_index).at[5].set(ignore_index)
    loss1 = label_smoothing_loss(
        out1, tgt1, label_smoothing=eps, tgt_vocab_size=v1, ignore_index=ignore_index)
    jax.block_until_ready(loss1)
    ref1 = _reference(
        out1, tgt1, label_smoothing=eps, tgt_vocab_size=v1, ignore_index=ignore_index)
    assert loss1.shape == (b1,)
    assert jnp.allclose(loss1, ref1, atol=1e-5, rtol=1e-5), (loss1, ref1)

    # Case 2: batch not a multiple of 8 (exercises the padding path).
    b2, v2 = 13, 256
    out2 = jax.random.normal(k3, (b2, v2), dtype=jnp.float32)
    tgt2 = jax.random.randint(k4, (b2,), 0, v2, dtype=jnp.int32)
    tgt2 = tgt2.at[0].set(ignore_index)
    loss2 = label_smoothing_loss(
        out2, tgt2, label_smoothing=eps, tgt_vocab_size=v2, ignore_index=ignore_index)
    jax.block_until_ready(loss2)
    ref2 = _reference(
        out2, tgt2, label_smoothing=eps, tgt_vocab_size=v2, ignore_index=ignore_index)
    assert loss2.shape == (b2,)
    assert jnp.allclose(loss2, ref2, atol=1e-5, rtol=1e-5), (loss2, ref2)

    print("KERNEL_OK")
</pallas_src>

<mosaic_0001>
module attributes {stable_mosaic.version = 11 : i64} {
  func.func @_label_smoothing_kernel(%arg0: i32, %arg1: memref<8x32xf32, #tpu.memory_space<vmem>>, %arg2: memref<8x1xi32, #tpu.memory_space<vmem>>, %arg3: memref<8x1xf32, #tpu.memory_space<vmem>>) attributes {dimension_semantics = [#tpu.dimension_semantics<parallel>], iteration_bounds = array<i64: 1>, scalar_prefetch = 0 : i64, scratch_operands = 0 : i64, tpu.core_type = #tpu.core_type<tc>, window_params = [{transform_indices = @transform_0, window_bounds = array<i64: 8, 32>}, {transform_indices = @transform_1, window_bounds = array<i64: 8, 1>}, {transform_indices = @transform_2, window_bounds = array<i64: 8, 1>}]} {
    %c0 = arith.constant 0 : index
    %c0_0 = arith.constant 0 : index
    %0 = vector.load %arg1[%c0, %c0_0] : memref<8x32xf32, #tpu.memory_space<vmem>>, vector<8x32xf32>
    %c0_1 = arith.constant 0 : index
    %c0_2 = arith.constant 0 : index
    %1 = vector.load %arg2[%c0_1, %c0_2] : memref<8x1xi32, #tpu.memory_space<vmem>>, vector<8x1xi32>
    %c-100_i32 = arith.constant -100 : i32
    %2 = vector.broadcast %c-100_i32 : i32 to vector<8x1xi32>
    %3 = arith.cmpi ne, %1, %2 : vector<8x1xi32>
    %c0_i32 = arith.constant 0 : i32
    %4 = vector.broadcast %c0_i32 : i32 to vector<8x1xi32>
    %5 = arith.select %3, %1, %4 : vector<8x1xi1>, vector<8x1xi32>
    %6 = tpu.iota {dimensions = array<i32: 1>} : vector<8x32xi32>
    %7 = vector.broadcast %5 : vector<8x1xi32> to vector<8x32xi32>
    %8 = arith.cmpi eq, %6, %7 : vector<8x32xi32>
    %cst = arith.constant dense<0xFF800000> : vector<8xf32>
    %9 = vector.multi_reduction <maximumf>, %0, %cst [1] : vector<8x32xf32> to vector<8xf32>
    %10 = vector.shape_cast %9 : vector<8xf32> to vector<8x1xf32>
    %11 = vector.broadcast %10 : vector<8x1xf32> to vector<8x32xf32>
    %12 = arith.subf %0, %11 : vector<8x32xf32>
    %13 = math.exp %12 : vector<8x32xf32>
    %cst_3 = arith.constant dense<0.000000e+00> : vector<8xf32>
    %14 = vector.multi_reduction <add>, %13, %cst_3 [1] : vector<8x32xf32> to vector<8xf32>
    %15 = vector.shape_cast %14 : vector<8xf32> to vector<8x1xf32>
    %16 = math.log %15 : vector<8x1xf32>
    %cst_4 = arith.constant dense<0.000000e+00> : vector<8xf32>
    %17 = vector.multi_reduction <add>, %12, %cst_4 [1] : vector<8x32xf32> to vector<8xf32>
    %18 = vector.shape_cast %17 : vector<8xf32> to vector<8x1xf32>
    %cst_5 = arith.constant 3.200000e+01 : f32
    %19 = vector.broadcast %cst_5 : f32 to vector<8x1xf32>
    %20 = arith.mulf %19, %16 : vector<8x1xf32>
    %21 = arith.subf %18, %20 : vector<8x1xf32>
    %cst_6 = arith.constant 0.000000e+00 : f32
    %22 = vector.broadcast %cst_6 : f32 to vector<8x32xf32>
    %23 = arith.select %8, %12, %22 : vector<8x32xi1>, vector<8x32xf32>
    %cst_7 = arith.constant dense<0.000000e+00> : vector<8xf32>
    %24 = vector.multi_reduction <add>, %23, %cst_7 [1] : vector<8x32xf32> to vector<8xf32>
    %25 = vector.shape_cast %24 : vector<8xf32> to vector<8x1xf32>
    %26 = arith.subf %25, %16 : vector<8x1xf32>
    %cst_8 = arith.constant 3.125000e-03 : f32
    %27 = vector.broadcast %cst_8 : f32 to vector<8x1xf32>
    %28 = arith.mulf %27, %21 : vector<8x1xf32>
    %cst_9 = arith.constant 8.968750e-01 : f32
    %29 = vector.broadcast %cst_9 : f32 to vector<8x1xf32>
    %30 = arith.mulf %29, %26 : vector<8x1xf32>
    %31 = arith.addf %28, %30 : vector<8x1xf32>
    %cst_10 = arith.constant 0.000000e+00 : f32
    %32 = vector.broadcast %cst_10 : f32 to vector<8x1xf32>
    %33 = arith.subf %32, %31 : vector<8x1xf32>
    %cst_11 = arith.constant 0.000000e+00 : f32
    %34 = vector.broadcast %cst_11 : f32 to vector<8x1xf32>
    %35 = arith.select %3, %33, %34 : vector<8x1xi1>, vector<8x1xf32>
    %c0_12 = arith.constant 0 : index
    %c0_13 = arith.constant 0 : index
    %36 = vector.load %arg3[%c0_12, %c0_13] : memref<8x1xf32, #tpu.memory_space<vmem>>, vector<8x1xf32>
    tpu.vector_store %arg3[%c0_12, %c0_13], %35 {strides = array<i32>} : memref<8x1xf32, #tpu.memory_space<vmem>>, vector<8x1xf32>,
    return
  }
  func.func @transform_0(%arg0: i32) -> (i32, i32) {
    %c0_i32 = arith.constant 0 : i32
    %c0_i32_0 = arith.constant 0 : i32
    return %arg0, %c0_i32 : i32, i32
  }
  func.func @transform_1(%arg0: i32) -> (i32, i32) {
    %c0_i32 = arith.constant 0 : i32
    %c0_i32_0 = arith.constant 0 : i32
    return %arg0, %c0_i32 : i32, i32
  }
  func.func @transform_2(%arg0: i32) -> (i32, i32) {
    %c0_i32 = arith.constant 0 : i32
    %c0_i32_0 = arith.constant 0 : i32
    return %arg0, %c0_i32 : i32, i32
  }
}

</mosaic_0001>

<bundles_post_ra>
// kernel: tpu_custom_call.1
= control target key start
LH: loop header
LB: loop body
LE: loop exit
PB: predicated region body
PF: predicated region fallthrough
CT: control target
= control target key end

     0   :  { %vm21_vm0 = vcmask 261120   ;;  %v60_v1 = vmov 0   ;;  %v15_v10 = vlaneseq  ;;  %vm48_vm3 = vcmask 7168   ;;  %s91_s0 = inlined_call_operand.vmem [shape: f32[8,32], index: 0, kind: input, shape index: {}]   ;;  %s92_s1 = inlined_call_operand.vmem [shape: s32[8,1], index: 1, kind: input, shape index: {}]   ;;  %s93_s2 = inlined_call_operand.vmem [shape: f32[8,1], index: 2, kind: output, shape index: {}]  }
   0x1   :  { %v11_v0 = vld [vmem:[%s91_s0] sm:$0xff]  ;;  %55 = vset.pattern.permute.xlu0 %v60_v1 }
   0x2   :  { %v22_v2 = vsel %vm21_vm0, %v11_v0, -inf  ;;  %v12_v3 = vld [vmem:[%s92_s1] sm:$0xff]  ;;  %v16_v11 = vand.u32 127, %v15_v10 }
   0x3   :  { %23 = vmax.xlane.f32.xlu0 %v22_v2  ;;  %vm13_vm1 = vcmp.ne.s32.totalorder %v12_v3, 4294967196 }
   0x4   :  { %v14_v4 = vsel %vm13_vm1, %v12_v3, 0 }
  0x17   :  { %18 = vperm.xlu0 %55, %v14_v4  }
  0x76   :  { %v24_v5 = vpop.xlane.xlu0 %23 }
  0x77   :  { %v25_v6 = vsub.f32 %v11_v0, %v24_v5 }
  0x79   :  { %v26_v7 = vmul.f32 1.442695, %v25_v6  ;;  %v33_v13 = vsel %vm21_vm0, %v25_v6, 0.0 }
  0x7b   :  { %56 = vpow2.f32 %v26_v7 }
  0x81   :  { %v57_v8 = vpop.eup %56 }
  0x82   :  { %v28_v9 = vsel %vm21_vm0, %v57_v8, 0.0 }
  0x83   :  { %29 = vadd.xlane.f32.xlu1 %v28_v9 }
  0x89   :  { %v19_v12 = vpop.permute.xlu0 %18 }
  0x8a   :  { %vm20_vm2 = vcmp.eq.s32.totalorder %v16_v11, %v19_v12 }
  0x8b   :  { %34 = vadd.xlane.f32.xlu1 %v33_v13  ;;  %v38_v14 = vsel %vm20_vm2, %v25_v6, 0.0 }
  0x8c   :  { %v39_v15 = vsel %vm21_vm0, %v38_v14, 0.0 }
  0x8d   :  { %40 = vadd.xlane.f32.xlu2 %v39_v15 }
  0xf6   :  { %v30_v16 = vpop.xlane.xlu1 %29 }
  0xf7   :  { %58 = vlog2.f32 %v30_v16 }
  0xfd   :  { %v59_v17 = vpop.eup %58 }
  0xfe   :  { %v32_v18 = vmul.f32 0.6931472, %v59_v17  ;;  %v35_v21 = vpop.xlane.xlu1 %34 }
 0x100   :  { %v36_v19 = vmul.f32 32.0, %v32_v18  ;;  %v41_v20 = vpop.xlane.xlu2 %40 }
 0x101   :  { %v42_v22 = vsub.f32 %v41_v20, %v32_v18 }
 0x102   :  { %v37_v23 = vsub.f32 %v35_v21, %v36_v19 }
 0x103   :  { %v44_v24 = vmul.f32 0.896875, %v42_v22 }
 0x104   :  { %v43_v25 = vmul.f32 0.003125, %v37_v23 }
 0x106   :  { %v45_v26 = vadd.f32 %v44_v24, %v43_v25 }
 0x108   :  { %v46_v27 = vsub.f32 0.0, %v45_v26 }
 0x10a   :  { %v47_v28 = vsel %vm13_vm1, %v46_v27, 0.0 }
 0x10b   :  { %49 = vst.msk [vmem:[%s93_s2] sm:$0xff] %vm48_vm3, %v47_v28 }

</bundles_post_ra>
